<compile_context>
chip_gen: v7x
topology: tpu7x:2x2x1
jax: 0.10.0
libtpu: 0.0.40
codegen_flags: <defaults>
</compile_context>

<pallas_src>
import jax
import jax.numpy as jnp
from jax.experimental import pallas as pl
from jax.experimental.pallas import tpu as pltpu


def _round_up(n, m):
    return ((n + m - 1) // m) * m


def _vmem_capacity_bytes():
    try:
        return int(pltpu.get_tpu_info().vmem_capacity_bytes)
    except Exception:
        return 64 * 1024 * 1024  # conservative default (v7x per-TC VMEM)


def _make_kernel(tk, x_resident, compute_dtype):
    def kernel(adj_ref, x_ref, w_ref, b_ref, o_ref, acc_ref):
        # adj_ref: (Bt, TM, TK)            x_ref: (Bt, N_pad, F_in) or (Bt, TK, F_in)
        # w_ref  : (F_in, F_out_p) bf16    b_ref: (1, F_out_p) f32
        # o_ref  : (Bt, TM, F_out_p)       acc_ref: (Bt, TM, F_in) f32 scratch
        k = pl.program_id(2)

        @pl.when(k == 0)
        def _():
            acc_ref[...] = jnp.zeros_like(acc_ref)

        adj_t = adj_ref[...].astype(compute_dtype)       # per-tile cast (VPU)
        if x_resident:
            start = pl.multiple_of(k * tk, tk)
            x_t = x_ref[:, pl.ds(start, tk), :].astype(compute_dtype)
        else:
            x_t = x_ref[...].astype(compute_dtype)

        # h += adj_tile @ x_tile  (per packed batch), bf16 MXU, f32 accumulate.
        acc_ref[...] += jnp.einsum(
            "bmk,bkf->bmf", adj_t, x_t, preferred_element_type=jnp.float32)

        @pl.when(k == pl.num_programs(2) - 1)
        def _():
            bt, tm, f_in = acc_ref.shape
            # Shared Linear on the flattened (Bt*TM, F_in) slab (fills MXU M),
            # lane-dense F_out_p result, then bias + ReLU on the VPU.
            h = acc_ref[...].astype(compute_dtype).reshape(bt * tm, f_in)
            y = jnp.dot(h, w_ref[...], preferred_element_type=jnp.float32)
            y = jnp.maximum(y + b_ref[...], 0.0)
            o_ref[...] = y.reshape(bt, tm, -1).astype(o_ref.dtype)

    return kernel


def graph_conv_layer(x, adj, weight, bias, *,
                     compute_dtype=jnp.bfloat16, out_dtype=None,
                     keep_padded=False):
    """relu(Linear(adj @ x)).

    x: [B, N, F_in], adj: [B, N, N], weight: [F_in, F_out], bias: [F_out].
    adj / x may be passed pre-cast to `compute_dtype` (cast once per model and
    reused by every GraphConv layer); otherwise tiles are cast in-kernel so no
    extra wrapper-side HBM pass over adj is made.
    """
    B, N, F_in = x.shape
    F_out = weight.shape[1]
    out_dtype = x.dtype if out_dtype is None else out_dtype

    # ---- lane-dense padding targets ------------------------------------------
    F_out_p = _round_up(F_out, 128)   # lane-dense output / full MXU result width
    N_pad = _round_up(N, 128)         # lane-dense adj tiles; TM/TK multiples of 128

    # ---- pad only when needed; otherwise pass through & cast in-kernel -------
    if N_pad != N:
        # Single pad+cast pass; the padded copy is bf16 (halves the re-read).
        adj_in = jnp.zeros((B, N_pad, N_pad), compute_dtype)
        adj_in = adj_in.at[:, :N, :N].set(adj.astype(compute_dtype))
        x_in = jnp.zeros((B, N_pad, F_in), compute_dtype)
        x_in = x_in.at[:, :N, :].set(x.astype(compute_dtype))
    else:
        adj_in = adj      # original dtype; cast per-tile inside the kernel
        x_in = x

    w_in = jnp.zeros((F_in, F_out_p), compute_dtype)
    w_in = w_in.at[:, :F_out].set(weight.astype(compute_dtype))
    b_in = jnp.zeros((1, F_out_p), jnp.float32)
    b_in = b_in.at[0, :F_out].set(bias.astype(jnp.float32))

    adj_bytes = jnp.dtype(adj_in.dtype).itemsize
    x_bytes = jnp.dtype(x_in.dtype).itemsize
    w_bytes = jnp.dtype(compute_dtype).itemsize
    out_bytes = jnp.dtype(out_dtype).itemsize

    # ---- generation-aware VMEM budget (v5e/v6e 128 MiB, v7x 64 MiB) ----------
    vmem_cap = _vmem_capacity_bytes()
    vmem_limit = int(vmem_cap * 0.8)
    tile_budget = int(vmem_limit * 0.85)

    # ---- batch packing: bt always divides B (no padded batches); keep >= 2
    # parallel batch tiles when B allows (v7x has 2 TensorCores). -------------
    if N_pad >= 256 or B == 1:
        bt = 1
    else:
        bt = 1
        for cand in (4, 2):
            if B % cand == 0 and B // cand >= 2:
                bt = cand
                break

    # ---- TM / TK: multiples of 128 that divide N_pad -------------------------
    m = N_pad // 128
    cands = sorted(128 * d for d in range(1, m + 1) if m % d == 0)

    tm_opts = [c for c in cands if c <= 512]
    TM = tm_opts[-1]
    if B // bt == 1:
        multi = [c for c in tm_opts if N_pad // c >= 2]
        if multi:
            TM = multi[-1]    # expose >= 2 row tiles so the 2nd TC gets work

    def vmem_need(tk, x_resident):
        adj_b = 2 * bt * TM * tk * adj_bytes                          # dbl-buf
        x_b = 2 * bt * (N_pad if x_resident else tk) * F_in * x_bytes
        w_b = 2 * F_in * F_out_p * w_bytes
        bias_b = 2 * F_out_p * 4
        out_b = 2 * bt * TM * F_out_p * out_bytes
        acc_b = bt * TM * F_in * 4
        return adj_b + x_b + w_b + bias_b + out_b + acc_b

    # Prefer x fully resident per batch (DMA'd once, not once per row tile) and
    # the largest TK that fits -- ideally TK == N_pad (k axis collapses to 1).
    TK, x_resident = None, True
    for c in reversed(cands):
        if vmem_need(c, True) <= tile_budget:
            TK = c
            break
    if TK is None:
        x_resident = False
        for c in reversed(cands):
            if vmem_need(c, False) <= tile_budget:
                TK = c
                break
        if TK is None:
            TK = 128          # last resort; vmem_limit still has headroom

    grid = (B // bt, N_pad // TM, N_pad // TK)

    if x_resident:
        x_spec = pl.BlockSpec((bt, N_pad, F_in), lambda b, i, k: (b, 0, 0))
    else:
        x_spec = pl.BlockSpec((bt, TK, F_in), lambda b, i, k: (b, k, 0))

    grid_spec = pltpu.PrefetchScalarGridSpec(
        num_scalar_prefetch=0,
        grid=grid,
        in_specs=[
            pl.BlockSpec((bt, TM, TK), lambda b, i, k: (b, i, k)),    # adj
            x_spec,                                                   # x
            pl.BlockSpec((F_in, F_out_p), lambda b, i, k: (0, 0)),    # W
            pl.BlockSpec((1, F_out_p), lambda b, i, k: (0, 0)),       # bias
        ],
        out_specs=pl.BlockSpec((bt, TM, F_out_p), lambda b, i, k: (b, i, 0)),
        scratch_shapes=[pltpu.VMEM((bt, TM, F_in), jnp.float32)],
    )

    out_p = pl.pallas_call(
        _make_kernel(TK, x_resident, compute_dtype),
        out_shape=jax.ShapeDtypeStruct((B, N_pad, F_out_p), out_dtype),
        grid_spec=grid_spec,
        compiler_params=pltpu.CompilerParams(
            dimension_semantics=("parallel", "parallel", "arbitrary"),
            vmem_limit_bytes=vmem_limit,
        ),
    )(adj_in, x_in, w_in, b_in)

    if keep_padded:
        return out_p          # stacked layers: keep padded layout, slice once
    if N_pad == N and F_out_p == F_out:
        return out_p
    return out_p[:, :N, :F_out]


def _reference(x, adj, weight, bias, compute_dtype=jnp.bfloat16):
    # Mirrors the kernel numerics: bf16-quantised operands, f32 accumulation,
    # h re-quantised to bf16 before the Linear.
    f32 = jnp.float32
    hp = jax.lax.Precision.HIGHEST
    adj_q = adj.astype(compute_dtype).astype(f32)
    x_q = x.astype(compute_dtype).astype(f32)
    w_q = weight.astype(compute_dtype).astype(f32)
    h = jnp.einsum("bij,bjf->bif", adj_q, x_q, precision=hp)
    h = h.astype(compute_dtype).astype(f32)
    y = jnp.einsum("bif,fo->bio", h, w_q, precision=hp) + bias.astype(f32)
    return jnp.maximum(y, 0.0)


if __name__ == "__main__":
    key = jax.random.PRNGKey(0)

    # ---- small example consistent with the module's forward ------------------
    B, N, F_in, F_out = 2, 16, 32, 32
    kx, kadj, kw, kb = jax.random.split(key, 4)

    x = jax.random.normal(kx, (B, N, F_in), dtype=jnp.float32)
    adj = jax.random.uniform(kadj, (B, N, N), dtype=jnp.float32)

    # nn.Linear-style init: U(-1/sqrt(in), 1/sqrt(in)); weight pre-transposed.
    bound = 1.0 / jnp.sqrt(jnp.float32(F_in))
    weight = jax.random.uniform(kw, (F_in, F_out), dtype=jnp.float32,
                                minval=-bound, maxval=bound)
    bias = jax.random.uniform(kb, (F_out,), dtype=jnp.float32,
                              minval=-bound, maxval=bound)

    out = graph_conv_layer(x, adj, weight, bias)
    out = jax.block_until_ready(out)
    ref = _reference(x, adj, weight, bias)
    assert out.shape == (B, N, F_out)
    assert jnp.allclose(out, ref, atol=1e-2, rtol=1e-2), "mismatch vs reference"

    # ---- second small check exercising the no-pad / in-kernel-cast path ------
    N2 = 128
    kx2, kadj2 = jax.random.split(kx, 2)
    x2 = jax.random.normal(kx2, (B, N2, F_in), dtype=jnp.float32)
    adj2 = jax.random.uniform(kadj2, (B, N2, N2), dtype=jnp.float32)
    out2 = jax.block_until_ready(graph_conv_layer(x2, adj2, weight, bias))
    ref2 = _reference(x2, adj2, weight, bias)
    assert out2.shape == (B, N2, F_out)
    assert jnp.allclose(out2, ref2, atol=1e-2, rtol=1e-2), "mismatch (no-pad path)"

    print("KERNEL_OK")
</pallas_src>

<mosaic_0001>
module attributes {stable_mosaic.version = 11 : i64} {
  func.func @kernel(%arg0: i32, %arg1: i32, %arg2: i32, %arg3: memref<1x128x128xbf16, #tpu.memory_space<vmem>>, %arg4: memref<1x128x32xbf16, #tpu.memory_space<vmem>>, %arg5: memref<32x128xbf16, #tpu.memory_space<vmem>>, %arg6: memref<1x128xf32, #tpu.memory_space<vmem>>, %arg7: memref<1x128x128xf32, #tpu.memory_space<vmem>>, %arg8: memref<1x128x32xf32, #tpu.memory_space<vmem>>) attributes {dimension_semantics = [#tpu.dimension_semantics<parallel>, #tpu.dimension_semantics<parallel>, #tpu.dimension_semantics<arbitrary>], iteration_bounds = array<i64: 2, 1, 1>, scalar_prefetch = 0 : i64, scratch_operands = 1 : i64, tpu.core_type = #tpu.core_type<tc>, window_params = [{transform_indices = @transform_0, window_bounds = array<i64: 1, 128, 128>}, {transform_indices = @transform_1, window_bounds = array<i64: 1, 128, 32>}, {pipeline_mode = #tpu.pipeline_mode<synchronous>, transform_indices = @transform_2, window_bounds = array<i64: 32, 128>}, {pipeline_mode = #tpu.pipeline_mode<synchronous>, transform_indices = @transform_3, window_bounds = array<i64: 1, 128>}, {transform_indices = @transform_4, window_bounds = array<i64: 1, 128, 128>}]} {
    %c0_i32 = arith.constant 0 : i32
    %0 = arith.cmpi eq, %arg2, %c0_i32 : i32
    %1 = arith.extui %0 : i1 to i32
    %c0_i32_0 = arith.constant 0 : i32
    %2 = arith.cmpi ne, %1, %c0_i32_0 : i32
    scf.if %2 {
      %cst_13 = arith.constant 0.000000e+00 : f32
      %15 = vector.broadcast %cst_13 : f32 to vector<1x128x32xf32>
      %c0_14 = arith.constant 0 : index
      %c0_15 = arith.constant 0 : index
      %c0_16 = arith.constant 0 : index
      %16 = vector.load %arg8[%c0_14, %c0_15, %c0_16] : memref<1x128x32xf32, #tpu.memory_space<vmem>>, vector<1x128x32xf32>
      tpu.vector_store %arg8[%c0_14, %c0_15, %c0_16], %15 {strides = array<i32>} : memref<1x128x32xf32, #tpu.memory_space<vmem>>, vector<1x128x32xf32>,
    } else {
    }
    %c0 = arith.constant 0 : index
    %c0_1 = arith.constant 0 : index
    %c0_2 = arith.constant 0 : index
    %3 = vector.load %arg3[%c0, %c0_1, %c0_2] : memref<1x128x128xbf16, #tpu.memory_space<vmem>>, vector<1x128x128xbf16>
    %c128_i32 = arith.constant 128 : i32
    %4 = arith.muli %arg2, %c128_i32 : i32
    %5 = tpu.assume_multiple %4, 128 : i32
    %c0_3 = arith.constant 0 : index
    %6 = arith.index_cast %5 : i32 to index
    %c0_4 = arith.constant 0 : index
    %7 = vector.load %arg4[%c0_3, %6, %c0_4] : memref<1x128x32xbf16, #tpu.memory_space<vmem>>, vector<1x128x32xbf16>
    %c0_5 = arith.constant 0 : index
    %c0_6 = arith.constant 0 : index
    %c0_7 = arith.constant 0 : index
    %8 = vector.load %arg8[%c0_5, %c0_6, %c0_7] : memref<1x128x32xf32, #tpu.memory_space<vmem>>, vector<1x128x32xf32>
    "tpu.trace_start"() <{level = 10 : i32, message = "bmk,bkf->bmf"}> : () -> ()
    %cst = arith.constant dense<0.000000e+00> : vector<1x128x32xf32>
    %9 = tpu.matmul %3, %7, %cst {dimension_numbers = #tpu.dot_dimension_numbers<[2], [1], [1], [2], [0, 0, 0, 1, 1, 2], [0], [0]>} : vector<1x128x128xbf16>, vector<1x128x32xbf16>, vector<1x128x32xf32> -> vector<1x128x32xf32>
    "tpu.trace_stop"() : () -> ()
    %10 = arith.addf %8, %9 : vector<1x128x32xf32>
    %c0_8 = arith.constant 0 : index
    %c0_9 = arith.constant 0 : index
    %c0_10 = arith.constant 0 : index
    %11 = vector.load %arg8[%c0_8, %c0_9, %c0_10] : memref<1x128x32xf32, #tpu.memory_space<vmem>>, vector<1x128x32xf32>
    tpu.vector_store %arg8[%c0_8, %c0_9, %c0_10], %10 {strides = array<i32>} : memref<1x128x32xf32, #tpu.memory_space<vmem>>, vector<1x128x32xf32>,
    %c0_i32_11 = arith.constant 0 : i32
    %12 = arith.cmpi eq, %arg2, %c0_i32_11 : i32
    %13 = arith.extui %12 : i1 to i32
    %c0_i32_12 = arith.constant 0 : i32
    %14 = arith.cmpi ne, %13, %c0_i32_12 : i32
    scf.if %14 {
      %c0_13 = arith.constant 0 : index
      %c0_14 = arith.constant 0 : index
      %c0_15 = arith.constant 0 : index
      %15 = vector.load %arg8[%c0_13, %c0_14, %c0_15] : memref<1x128x32xf32, #tpu.memory_space<vmem>>, vector<1x128x32xf32>
      %16 = arith.truncf %15 : vector<1x128x32xf32> to vector<1x128x32xbf16>
      %17 = vector.shape_cast %16 : vector<1x128x32xbf16> to vector<128x32xbf16>
      %c0_16 = arith.constant 0 : index
      %c0_17 = arith.constant 0 : index
      %18 = vector.load %arg5[%c0_16, %c0_17] : memref<32x128xbf16, #tpu.memory_space<vmem>>, vector<32x128xbf16>
      %cst_18 = arith.constant dense<0.000000e+00> : vector<128x128xf32>
      %19 = tpu.matmul %17, %18, %cst_18 {dimension_numbers = #tpu.dot_dimension_numbers<[1], [0], [0], [1], [0, 0, 1, 1], [], []>} : vector<128x32xbf16>, vector<32x128xbf16>, vector<128x128xf32> -> vector<128x128xf32>
      %c0_19 = arith.constant 0 : index
      %c0_20 = arith.constant 0 : index
      %20 = vector.load %arg6[%c0_19, %c0_20] : memref<1x128xf32, #tpu.memory_space<vmem>>, vector<1x128xf32>
      %21 = vector.broadcast %20 : vector<1x128xf32> to vector<128x128xf32>
      %22 = arith.addf %19, %21 : vector<128x128xf32>
      %cst_21 = arith.constant 0.000000e+00 : f32
      %23 = vector.broadcast %cst_21 : f32 to vector<128x128xf32>
      %24 = arith.maximumf %22, %23 : vector<128x128xf32>
      %25 = vector.shape_cast %24 : vector<128x128xf32> to vector<1x128x128xf32>
      %c0_22 = arith.constant 0 : index
      %c0_23 = arith.constant 0 : index
      %c0_24 = arith.constant 0 : index
      %26 = vector.load %arg7[%c0_22, %c0_23, %c0_24] : memref<1x128x128xf32, #tpu.memory_space<vmem>>, vector<1x128x128xf32>
      tpu.vector_store %arg7[%c0_22, %c0_23, %c0_24], %25 {strides = array<i32>} : memref<1x128x128xf32, #tpu.memory_space<vmem>>, vector<1x128x128xf32>,
    } else {
    }
    return
  }
  func.func @transform_0(%arg0: i32, %arg1: i32, %arg2: i32) -> (i32, i32, i32) {
    %c0_i32 = arith.constant 0 : i32
    return %arg0, %arg1, %arg2 : i32, i32, i32
  }
  func.func @transform_1(%arg0: i32, %arg1: i32, %arg2: i32) -> (i32, i32, i32) {
    %c0_i32 = arith.constant 0 : i32
    %c0_i32_0 = arith.constant 0 : i32
    %c0_i32_1 = arith.constant 0 : i32
    return %arg0, %c0_i32, %c0_i32_0 : i32, i32, i32
  }
  func.func @transform_2(%arg0: i32, %arg1: i32, %arg2: i32) -> (i32, i32) {
    %c0_i32 = arith.constant 0 : i32
    %c0_i32_0 = arith.constant 0 : i32
    %c0_i32_1 = arith.constant 0 : i32
    return %c0_i32, %c0_i32_0 : i32, i32
  }
  func.func @transform_3(%arg0: i32, %arg1: i32, %arg2: i32) -> (i32, i32) {
    %c0_i32 = arith.constant 0 : i32
    %c0_i32_0 = arith.constant 0 : i32
    %c0_i32_1 = arith.constant 0 : i32
    return %c0_i32, %c0_i32_0 : i32, i32
  }
  func.func @transform_4(%arg0: i32, %arg1: i32, %arg2: i32) -> (i32, i32, i32) {
    %c0_i32 = arith.constant 0 : i32
    %c0_i32_0 = arith.constant 0 : i32
    return %arg0, %arg1, %c0_i32 : i32, i32, i32
  }
}

</mosaic_0001>

<bundles_post_ra>
// kernel: tpu_custom_call.1
= control target key start
LH: loop header
LB: loop body
LE: loop exit
PB: predicated region body
PF: predicated region fallthrough
CT: control target
= control target key end

     0   :  { %9 = vsyncpa [#allocation4], 0  ;;  %s1394_s0 = inlined_call_operand.vmem [shape: bf16[2,128,128], index: 0, kind: input, shape index: {}]   ;;  %s1395_s1 = inlined_call_operand.vmem [shape: bf16[2,128,32], index: 1, kind: input, shape index: {}]   ;;  %s1396_s2 = inlined_call_operand.vmem [shape: bf16[32,128], index: 2, kind: input, shape index: {}]   ;;  %s1397_s3 = inlined_call_operand.vmem [shape: f32[1,128], index: 3, kind: input, shape index: {}]   ;;  %s1398_s4 = inlined_call_operand.hbm [shape: f32[2,128,128], index: 4, kind: output, shape index: {}]  }
   0x1   :  { %11 = vsyncpa [#allocation4 + $0x1], 0  ;;  %s1192_s15 = smov 0   ;;  %s1194_s16 = smov 0  }
   0x2   :  { %s1196_s17 = smov 0   ;;  %s1198_s18 = smov 0  }
   0x3   :  { %s1200_s19 = smov 0   ;;  %s1202_s20 = smov 0  }
   0x4 LB: > { %s884_s21 = sadd.s32 4294967295, %s1161_s20   ;;  %s885_s22 = sadd.s32 4294967294, %s1161_s20   ;;  %s1161_s20 = sphi %s1202_s20, %s17_s20   ;;  %s1157_s19 = sphi %s1200_s19, %s1405_s19   ;;  %s1153_s18 = sphi %s1198_s18, %s1404_s18   ;;  %s1149_s17 = sphi %s1196_s17, %s1403_s17   ;;  %s1145_s16 = sphi %s1194_s16, %s1402_s16   ;;  %s1141_s15 = sphi %s1192_s15, %s1401_s15  }
   0x5   : > { %s36_s23 = sadd.s32 1, %s1157_s19  ;;  %s143_s24 = sadd.s32 1, %s1149_s17 }
   0x6   : > { %p38_p0 = scmp.ge.s32.totalorder %s36_s23, 2  ;;  %p153_p1 = scmp.ne.s32.totalorder %s1149_s17, %s1145_s16 }
   0x7   : > { %p154_p2 = scmp.eq.s32.totalorder %s884_s21, 1  ;;  %p159_p3 = scmp.ne.s32.totalorder %s1145_s16, %s1141_s15 }
   0x8   : > { %s1407_s23 = smov (%p38_p0, %s36_s23), 0  ;;  %p160_p5 = scmp.eq.s32.totalorder %s885_s22, 1 }
   0x9   : > { %p1232_p4 = por %p154_p2, %p153_p1  ;;  %s138_s26 = ssub.s32 %s1157_s19, %s1407_s23 }
   0xa   : > { %p888_p6 = scmp.ge.s32.totalorder %s1161_s20, 1  ;;  %p141_p7 = scmp.eq.s32.totalorder %s138_s26, 0 }
   0xb   : > { %p1239_p8 = por %p160_p5, %p159_p3  ;;  %p208_p9 = scmp.lt.s32.totalorder %s1161_s20, 3 }
   0xc   : > { %s1245_s28 = scalar_select %p141_p7, %s1149_s17, %s143_s24  }
   0xd   : > { %p209_p10 = pnand %p888_p6, %p208_p9 }
   0xe   : > { %p247_p11 = scmp.lt.s32.totalorder (!%p209_p10), %s1153_s18, 1  ;;  %vm270_vm0 = vcmask (!%p209_p10), 261120   ;;  %v1163_v0 = vmov (!%p209_p10), 0.0   ;;  %v1081_v17 = vld [vmem:[%s1396_s2] sm:$0xff] (!%p209_p10)   ;;  %v1082_v18 = vld [vmem:[%s1396_s2 + $0x8] sm:$0xff] (!%p209_p10)   ;;  %s243_s21 = sand.u32 (!%p209_p10), 1, %s1145_s16  }
   0xf   : > { %212 = sbr.rel (%p209_p10) target bundleno = 545 (0x221), region = 36  ;;  %273 = vst.msk [vmem:[#allocation2 + $0x10] sm:$0xff] (!%p209_p10), %vm270_vm0, %v1163_v0  ;;  %271 = vst.msk [vmem:[#allocation2] sm:$0xff] (!%p209_p10), %vm270_vm0, %v1163_v0  ;;  %987 = vmatprep.subr.bf16.mxu1 (!%p209_p10), %v1081_v17  ;;  %s889_s26 = sshll.u32 (!%p209_p10), %s243_s21, 7 }
  0x10   : > { %272 = vst.msk [vmem:[#allocation2 + $0x8] sm:$0xff] (!%p209_p10), %vm270_vm0, %v1163_v0  ;;  %274 = vst.msk [vmem:[#allocation2 + $0x18] sm:$0xff] (!%p209_p10), %vm270_vm0, %v1163_v0  ;;  %988 = vmatpush3.bf16.msra.mxu1 (!%p209_p10), %v1081_v17 }
  0x11   : > { %275 = vst.msk [vmem:[#allocation2 + $0x20] sm:$0xff] (!%p209_p10), %vm270_vm0, %v1163_v0  ;;  %276 = vst.msk [vmem:[#allocation2 + $0x28] sm:$0xff] (!%p209_p10), %vm270_vm0, %v1163_v0  ;;  %989 = vmatprep.subr.bf16.mxu1 (!%p209_p10), %v1082_v18 }
  0x12   : > { %277 = vst.msk [vmem:[#allocation2 + $0x30] sm:$0xff] (!%p209_p10), %vm270_vm0, %v1163_v0  ;;  %278 = vst.msk [vmem:[#allocation2 + $0x38] sm:$0xff] (!%p209_p10), %vm270_vm0, %v1163_v0 }
  0x13   : > { %279 = vst.msk [vmem:[#allocation2 + $0x40] sm:$0xff] (!%p209_p10), %vm270_vm0, %v1163_v0  ;;  %280 = vst.msk [vmem:[#allocation2 + $0x48] sm:$0xff] (!%p209_p10), %vm270_vm0, %v1163_v0 }
  0x14   : > { %281 = vst.msk [vmem:[#allocation2 + $0x50] sm:$0xff] (!%p209_p10), %vm270_vm0, %v1163_v0  ;;  %282 = vst.msk [vmem:[#allocation2 + $0x58] sm:$0xff] (!%p209_p10), %vm270_vm0, %v1163_v0  ;;  %990 = vmatpush3.bf16.msra.mxu1 (!%p209_p10), %v1082_v18 }
  0x15   : > { %283 = vst.msk [vmem:[#allocation2 + $0x60] sm:$0xff] (!%p209_p10), %vm270_vm0, %v1163_v0  ;;  %284 = vst.msk [vmem:[#allocation2 + $0x68] sm:$0xff] (!%p209_p10), %vm270_vm0, %v1163_v0 }
  0x16   : > { %285 = vst.msk [vmem:[#allocation2 + $0x70] sm:$0xff] %vm270_vm0, %v1163_v0  ;;  %286 = vst.msk [vmem:[#allocation2 + $0x78] sm:$0xff] %vm270_vm0, %v1163_v0  ;;  %s248_s29 = scalar_select %p247_p11, %s1153_s18, 1  ;;  %v326_v19 = vld [vmem:[#allocation2 + $0x10] sm:$0xff]  ;;  %v324_v20 = vld [vmem:[#allocation2] sm:$0xff] }
  0x17   : > { %v327_v22 = vld [vmem:[#allocation2 + $0x18] sm:$0xff]  ;;  %v325_v25 = vld [vmem:[#allocation2 + $0x8] sm:$0xff] }
  0x18   : > { %s926_s30 = sshll.u32 %s248_s29, 6  ;;  %v328_v32 = vld [vmem:[#allocation2 + $0x20] sm:$0xff]  ;;  %v329_v37 = vld [vmem:[#allocation2 + $0x28] sm:$0xff]  ;;  %s1319_s29 = scalar_lea.vmem [#allocation3], %s889_s26 }
  0x19   : > { %s263_s7 = scalar_lea.vmem %s1395_s1, %s926_s30  ;;  %s1273_s10 = scalar_lea.vmem %s1394_s0, %s926_s30  ;;  %v330_v31 = vld [vmem:[#allocation2 + $0x30] sm:$0xff]  ;;  %v331_v34 = vld [vmem:[#allocation2 + $0x38] sm:$0xff] }
  0x1a   : > { %v1065_v1 = vld [vmem:[%s263_s7] sm:$0xff]   ;;  %v1066_v2 = vld [vmem:[%s263_s7 + $0x8] sm:$0xff]   ;;  %v1067_v3 = vld [vmem:[%s263_s7 + $0x10] sm:$0xff]   ;;  %s928_s30 = sshll.u32 %s1153_s18, 11  ;;  %s785_s5 = sshll.u32 %s1319_s29, 4  ;;  %s1341_s5 = int_to_ptr.vmem [resolvable:$true] %s785_s5 }
  0x1b   : > { %955 = vmatprep.subr.bf16.mxu0 %v1065_v1  ;;  %v1068_v4 = vld [vmem:[%s263_s7 + $0x18] sm:$0xff]   ;;  %v1073_v5 = vld [vmem:[%s1273_s10] sm:$0xff]   ;;  %v1070_v7 = vld [vmem:[%s263_s7 + $0x28] sm:$0xff]   ;;  %s1339_s8 = scalar_lea.hbm %s1398_s4, %s928_s30  ;;  %s1348_s18 = scalar_lea.sflag [#allocation4], %s243_s21 }
  0x1c   : > { %956 = vmatpush3.bf16.msra.mxu0 %v1065_v1  ;;  %971 = vmatprep.mubr.bf16.mxu0 %v1073_v5  ;;  %v1069_v6 = vld [vmem:[%s263_s7 + $0x20] sm:$0xff]   ;;  %v1071_v8 = vld [vmem:[%s263_s7 + $0x30] sm:$0xff]   ;;  %v1072_v9 = vld [vmem:[%s263_s7 + $0x38] sm:$0xff]   ;;  %s1083_s9 = scalar_lea.vmem %s1341_s5, 2048 }
  0x1d   : > { %957 = vmatprep.subr.bf16.mxu0 %v1066_v2  ;;  %v1074_v10 = vld [vmem:[%s1273_s10 + $0x8] sm:$0xff]   ;;  %v1075_v11 = vld [vmem:[%s1273_s10 + $0x10] sm:$0xff]   ;;  %v1076_v12 = vld [vmem:[%s1273_s10 + $0x18] sm:$0xff]   ;;  %p1084_p12 = scmp.ne.s32.totalorder %s1341_s5, %s1083_s9 }
  0x1e   : > { %v1077_v13 = vld [vmem:[%s1273_s10 + $0x20] sm:$0xff]   ;;  %v1078_v14 = vld [vmem:[%s1273_s10 + $0x28] sm:$0xff]   ;;  %v1079_v15 = vld [vmem:[%s1273_s10 + $0x30] sm:$0xff]  }
  0x1f   : > { %v1080_v16 = vld [vmem:[%s1273_s10 + $0x38] sm:$0xff]   ;;  %v334_v46 = vld [vmem:[#allocation2 + $0x50] sm:$0xff]  ;;  %v332_v49 = vld [vmem:[#allocation2 + $0x40] sm:$0xff]  ;;  %p1085_p13 = pnand %p1084_p12, %p1232_p4  ;;  %s1164_s10 = smov [#allocation3]  }
  0x20   : > { %958 = vmatpush3.bf16.msra.mxu0 %v1066_v2  ;;  %v335_v52 = vld [vmem:[#allocation2 + $0x58] sm:$0xff]  ;;  %v333_v55 = vld [vmem:[#allocation2 + $0x48] sm:$0xff]  ;;  %v338_v0 = vld [vmem:[#allocation2 + $0x70] sm:$0xff]  ;;  %s1087_s11 = sshll.u32 %s1164_s10, 4  ;;  %s1088_s11 = int_to_ptr.vmem [resolvable:$false] %s1087_s11 }
  0x21   : > { %959 = vmatprep.subr.bf16.mxu0 %v1067_v3  ;;  %p1086_p0 = pneg %p1085_p13  ;;  %s1089_s12 = scalar_lea.vmem %s1088_s11, 4096 }
  0x22   : > { %p1090_p1 = scmp.lt.s32.totalorder %s1341_s5, %s1088_s11  ;;  %p1091_p2 = scmp.lt.s32.totalorder %s1089_s12, %s1083_s9 }
  0x24   : > { %960 = vmatpush3.bf16.msra.mxu0 %v1067_v3  ;;  %v336_v3 = vld [vmem:[#allocation2 + $0x60] sm:$0xff]  ;;  %p1092_p3 = por %p1091_p2, %p1090_p1 }
  0x25   : > { %961 = vmatprep.subr.bf16.mxu0 %v1068_v4 }
  0x26   : > { %p1093_p5 = pnand %p1092_p3, %p1086_p0 }
  0x28   : > { %962 = vmatpush3.bf16.msra.mxu0 %v1068_v4 }
  0x29   : > { %963 = vmatprep.subr.bf16.mxu0 %v1069_v6 }
  0x2c   : > { %964 = vmatpush3.bf16.msra.mxu0 %v1069_v6  ;;  %v339_v6 = vld [vmem:[#allocation2 + $0x78] sm:$0xff] }
  0x2d   : > { %965 = vmatprep.subr.bf16.mxu0 %v1070_v7 }
  0x30   : > { %966 = vmatpush3.bf16.msra.mxu0 %v1070_v7 }
  0x31   : > { %967 = vmatprep.subr.bf16.mxu0 %v1071_v8 }
  0x34   : > { %968 = vmatpush3.bf16.msra.mxu0 %v1071_v8 }
  0x35   : > { %969 = vmatprep.subr.bf16.mxu0 %v1072_v9 }
  0x38   : > { %970 = vmatpush3.bf16.msra.mxu0 %v1072_v9  ;;  %v337_v9 = vld [vmem:[#allocation2 + $0x68] sm:$0xff] }
  0x3b   : > { %972 = vmatmul.mubr.bf16.vlgmr.msra.gmra.mrb[0].mxu0 %v1074_v10 }
  0x3c   : > { %975 = vmatprep.mubr.bf16.mxu0 %v1075_v11 }
  0x43   : > { %976 = vmatmul.mubr.bf16.gmra.mrb[4].mxu0 %v1076_v12 }
  0x44   : > { %979 = vmatprep.mubr.bf16.mxu0 %v1077_v13 }
  0x4b   : > { %980 = vmatmul.mubr.bf16.gmra.mrb[8].mxu0 %v1078_v14 }
  0x4c   : > { %983 = vmatprep.mubr.bf16.mxu0 %v1079_v15 }
  0x53   : > { %984 = vmatmul.mubr.bf16.gmra.mrb[12].mxu0 %v1080_v16 }
 0x10e   : > { %v973_v21 = vpop.f32.mrb[0].mxu0 }
 0x10f   : > { %v535_v23 = vadd.f32 %v973_v21, %v326_v19  ;;  %v470_v24 = vpop.f32.mrb[1].mxu0 }
 0x110   : > { %v533_v26 = vadd.f32 %v470_v24, %v324_v20  ;;  %v974_v27 = vpop.f32.mrb[2].mxu0 }
 0x111   : > { %552 = vst.msk [vmem:[#allocation2 + $0x10] sm:$0xff] %vm270_vm0, %v535_v23  ;;  %v536_v28 = vadd.f32 %v974_v27, %v327_v22  ;;  %v473_v29 = vpop.f32.mrb[3].mxu0  ;;  %v910_v27 = vld [vmem:[%s1397_s3] ss:$0 sm:$0xff] }
 0x112   : > { %550 = vst.msk [vmem:[#allocation2] sm:$0xff] %vm270_vm0, %v533_v26  ;;  %v534_v30 = vadd.f32 %v473_v29, %v325_v25 }
 0x113   : > { %553 = vst.msk [vmem:[#allocation2 + $0x18] sm:$0xff] %vm270_vm0, %v536_v28 }
 0x114   : > { %551 = vst.msk [vmem:[#allocation2 + $0x8] sm:$0xff] %vm270_vm0, %v534_v30 }
 0x116   : > { %v977_v33 = vpop.f32.mrb[4].mxu0 }
 0x117   : > { %v539_v35 = vadd.f32 %v977_v33, %v330_v31  ;;  %v486_v36 = vpop.f32.mrb[5].mxu0 }
 0x118   : > { %v537_v38 = vadd.f32 %v486_v36, %v328_v32  ;;  %v978_v39 = vpop.f32.mrb[6].mxu0  ;;  %v571_v48 = vld [vmem:[#allocation2 + $0x10] sm:$0xff] }
 0x119   : > { %556 = vst.msk [vmem:[#allocation2 + $0x30] sm:$0xff] %vm270_vm0, %v539_v35  ;;  %v540_v40 = vadd.f32 %v978_v39, %v331_v34  ;;  %v489_v41 = vpop.f32.mrb[7].mxu0  ;;  %v569_v44 = vld [vmem:[#allocation2] sm:$0xff] }
 0x11a   : > { %554 = vst.msk [vmem:[#allocation2 + $0x20] sm:$0xff] %vm270_vm0, %v537_v38  ;;  %v538_v42 = vadd.f32 %v489_v41, %v329_v37  ;;  %v572_v43 = vld [vmem:[#allocation2 + $0x18] sm:$0xff] }
 0x11b   : > { %557 = vst.msk [vmem:[#allocation2 + $0x38] sm:$0xff] %vm270_vm0, %v540_v40  ;;  %v570_v45 = vld [vmem:[#allocation2 + $0x8] sm:$0xff]  ;;  %v586_v50 = vpack.c.bf16 %v572_v43, %v571_v48 }
 0x11c   : > { %555 = vst.msk [vmem:[#allocation2 + $0x28] sm:$0xff] %vm270_vm0, %v538_v42  ;;  %v585_v47 = vpack.c.bf16 %v570_v45, %v569_v44 }
 0x11e   : > { %v981_v51 = vpop.f32.mrb[8].mxu0  ;;  %991 = vmatprep.mubr.msk.bf16.mxu1 %vm270_vm0, %v585_v47 }
 0x11f   : > { %v543_v53 = vadd.f32 %v981_v51, %v334_v46  ;;  %v502_v54 = vpop.f32.mrb[9].mxu0  ;;  %992 = vmatmul.mubr.msk.bf16.vlgmr.msra.gmra.mrb[0].mxu1 %vm270_vm0, %v586_v50 }
 0x120   : > { %v541_v56 = vadd.f32 %v502_v54, %v332_v49  ;;  %v982_v57 = vpop.f32.mrb[10].mxu0  ;;  %v575_v2 = vld [vmem:[#allocation2 + $0x30] sm:$0xff] }
 0x121   : > { %560 = vst.msk [vmem:[#allocation2 + $0x50] sm:$0xff] %vm270_vm0, %v543_v53  ;;  %v544_v58 = vadd.f32 %v982_v57, %v335_v52  ;;  %v505_v59 = vpop.f32.mrb[11].mxu0  ;;  %v573_v62 = vld [vmem:[#allocation2 + $0x20] sm:$0xff] }
 0x122   : > { %558 = vst.msk [vmem:[#allocation2 + $0x40] sm:$0xff] %vm270_vm0, %v541_v56  ;;  %v542_v60 = vadd.f32 %v505_v59, %v333_v55  ;;  %v576_v61 = vld [vmem:[#allocation2 + $0x38] sm:$0xff] }
 0x123   : > { %561 = vst.msk [vmem:[#allocation2 + $0x58] sm:$0xff] %vm270_vm0, %v544_v58  ;;  %v574_v63 = vld [vmem:[#allocation2 + $0x28] sm:$0xff]  ;;  %v588_v4 = vpack.c.bf16 %v576_v61, %v575_v2 }
 0x124   : > { %559 = vst.msk [vmem:[#allocation2 + $0x48] sm:$0xff] %vm270_vm0, %v542_v60  ;;  %v587_v1 = vpack.c.bf16 %v574_v63, %v573_v62 }
 0x126   : > { %v985_v5 = vpop.f32.mrb[12].mxu0  ;;  %995 = vmatprep.mubr.msk.bf16.mxu1 %vm270_vm0, %v587_v1 }
 0x127   : > { %v547_v7 = vadd.f32 %v985_v5, %v338_v0  ;;  %v518_v8 = vpop.f32.mrb[13].mxu0  ;;  %996 = vmatmul.mubr.msk.bf16.gmra.mrb[4].mxu1 %vm270_vm0, %v588_v4 }
 0x128   : > { %v545_v10 = vadd.f32 %v518_v8, %v336_v3  ;;  %v986_v11 = vpop.f32.mrb[14].mxu0  ;;  %v579_v19 = vld [vmem:[#allocation2 + $0x50] sm:$0xff] }
 0x129   : > { %564 = vst.msk [vmem:[#allocation2 + $0x70] sm:$0xff] %vm270_vm0, %v547_v7  ;;  %v548_v12 = vadd.f32 %v986_v11, %v339_v6  ;;  %v521_v13 = vpop.f32.mrb[15].mxu0  ;;  %v577_v16 = vld [vmem:[#allocation2 + $0x40] sm:$0xff] }
 0x12a   : > { %562 = vst.msk [vmem:[#allocation2 + $0x60] sm:$0xff] %vm270_vm0, %v545_v10  ;;  %v546_v14 = vadd.f32 %v521_v13, %v337_v9  ;;  %v580_v15 = vld [vmem:[#allocation2 + $0x58] sm:$0xff] }
 0x12b   : > { %565 = vst.msk [vmem:[#allocation2 + $0x78] sm:$0xff] %vm270_vm0, %v548_v12  ;;  %v578_v17 = vld [vmem:[#allocation2 + $0x48] sm:$0xff]  ;;  %v590_v20 = vpack.c.bf16 %v580_v15, %v579_v19 }
 0x12c   : > { %563 = vst.msk [vmem:[#allocation2 + $0x68] sm:$0xff] %vm270_vm0, %v546_v14  ;;  %v589_v18 = vpack.c.bf16 %v578_v17, %v577_v16 }
 0x12e   : > { %999 = vmatprep.mubr.msk.bf16.mxu1 %vm270_vm0, %v589_v18 }
 0x12f   : > { %1000 = vmatmul.mubr.msk.bf16.gmra.mrb[8].mxu1 %vm270_vm0, %v590_v20 }
 0x130   : > { %v583_v25 = vld [vmem:[#allocation2 + $0x70] sm:$0xff] }
 0x131   : > { %v581_v22 = vld [vmem:[#allocation2 + $0x60] sm:$0xff] }
 0x132   : > { %v584_v21 = vld [vmem:[#allocation2 + $0x78] sm:$0xff] }
 0x133   : > { %v582_v23 = vld [vmem:[#allocation2 + $0x68] sm:$0xff]  ;;  %v592_v26 = vpack.c.bf16 %v584_v21, %v583_v25 }
 0x134   : > { %v591_v24 = vpack.c.bf16 %v582_v23, %v581_v22 }
 0x136   : > { %1003 = vmatprep.mubr.msk.bf16.mxu1 %vm270_vm0, %v591_v24 }
 0x137   : > { %1004 = vmatmul.mubr.msk.bf16.gmra.mrb[12].mxu1 %vm270_vm0, %v592_v26 }
 0x1f2   : > { %v993_v28 = vpop.f32.mrb[0].mxu1 }
 0x1f3   : > { %v683_v29 = vadd.f32 %v993_v28, %v910_v27  ;;  %v674_v30 = vpop.f32.mrb[1].mxu1 }
 0x1f4   : > { %v675_v31 = vadd.f32 %v910_v27, %v674_v30  ;;  %v994_v32 = vpop.f32.mrb[2].mxu1 }
 0x1f5   : > { %v739_v33 = vmax.f32 %v683_v29, 0.0  ;;  %v686_v34 = vadd.f32 %v994_v32, %v910_v27  ;;  %v677_v35 = vpop.f32.mrb[3].mxu1 }
 0x1f6   : > { %v737_v36 = vmax.f32 %v675_v31, 0.0  ;;  %v678_v37 = vadd.f32 %v910_v27, %v677_v35 }
 0x1f7   : > { %755 = vst [vmem:[%s1319_s29 + $0x10] sm:$0xff] %v739_v33  ;;  %v740_v38 = vmax.f32 %v686_v34, 0.0 }
 0x1f8   : > { %753 = vst [vmem:[%s1319_s29] sm:$0xff] %v737_v36  ;;  %v738_v39 = vmax.f32 %v678_v37, 0.0 }
 0x1f9   : > { %756 = vst [vmem:[%s1319_s29 + $0x18] sm:$0xff] %v740_v38 }
 0x1fa   : > { %754 = vst [vmem:[%s1319_s29 + $0x8] sm:$0xff] %v738_v39  ;;  %v997_v40 = vpop.f32.mrb[4].mxu1 }
 0x1fb   : > { %v699_v41 = vadd.f32 %v997_v40, %v910_v27  ;;  %v690_v42 = vpop.f32.mrb[5].mxu1 }
 0x1fc   : > { %v691_v43 = vadd.f32 %v910_v27, %v690_v42  ;;  %v998_v44 = vpop.f32.mrb[6].mxu1 }
 0x1fd   : > { %v743_v45 = vmax.f32 %v699_v41, 0.0  ;;  %v702_v46 = vadd.f32 %v998_v44, %v910_v27  ;;  %v693_v47 = vpop.f32.mrb[7].mxu1 }
 0x1fe   : > { %v741_v48 = vmax.f32 %v691_v43, 0.0  ;;  %v694_v49 = vadd.f32 %v910_v27, %v693_v47 }
 0x1ff   : > { %759 = vst [vmem:[%s1319_s29 + $0x30] sm:$0xff] %v743_v45  ;;  %v744_v50 = vmax.f32 %v702_v46, 0.0 }
 0x200   : > { %757 = vst [vmem:[%s1319_s29 + $0x20] sm:$0xff] %v741_v48  ;;  %v742_v51 = vmax.f32 %v694_v49, 0.0 }
 0x201   : > { %760 = vst [vmem:[%s1319_s29 + $0x38] sm:$0xff] %v744_v50 }
 0x202   : > { %758 = vst [vmem:[%s1319_s29 + $0x28] sm:$0xff] %v742_v51  ;;  %v1001_v52 = vpop.f32.mrb[8].mxu1 }
 0x203   : > { %v715_v53 = vadd.f32 %v1001_v52, %v910_v27  ;;  %v706_v54 = vpop.f32.mrb[9].mxu1 }
 0x204   : > { %v707_v55 = vadd.f32 %v910_v27, %v706_v54  ;;  %v1002_v56 = vpop.f32.mrb[10].mxu1 }
 0x205   : > { %v747_v57 = vmax.f32 %v715_v53, 0.0  ;;  %v718_v58 = vadd.f32 %v1002_v56, %v910_v27  ;;  %v709_v59 = vpop.f32.mrb[11].mxu1 }
 0x206   : > { %v745_v60 = vmax.f32 %v707_v55, 0.0  ;;  %v710_v61 = vadd.f32 %v910_v27, %v709_v59 }
 0x207   : > { %763 = vst [vmem:[%s1319_s29 + $0x50] sm:$0xff] %v747_v57  ;;  %v748_v62 = vmax.f32 %v718_v58, 0.0 }
 0x208   : > { %761 = vst [vmem:[%s1319_s29 + $0x40] sm:$0xff] %v745_v60  ;;  %v746_v63 = vmax.f32 %v710_v61, 0.0 }
 0x209   : > { %764 = vst [vmem:[%s1319_s29 + $0x58] sm:$0xff] %v748_v62 }
 0x20a   : > { %762 = vst [vmem:[%s1319_s29 + $0x48] sm:$0xff] %v746_v63  ;;  %v1005_v0 = vpop.f32.mrb[12].mxu1 }
 0x20b   : > { %v731_v1 = vadd.f32 %v1005_v0, %v910_v27  ;;  %v722_v2 = vpop.f32.mrb[13].mxu1 }
 0x20c   : > { %v723_v3 = vadd.f32 %v910_v27, %v722_v2  ;;  %v1006_v4 = vpop.f32.mrb[14].mxu1 }
 0x20d   : > { %v751_v5 = vmax.f32 %v731_v1, 0.0  ;;  %v734_v6 = vadd.f32 %v1006_v4, %v910_v27  ;;  %v725_v7 = vpop.f32.mrb[15].mxu1 }
 0x20e   : > { %v749_v8 = vmax.f32 %v723_v3, 0.0  ;;  %v726_v9 = vadd.f32 %v910_v27, %v725_v7 }
 0x20f   : > { %767 = vst [vmem:[%s1319_s29 + $0x70] sm:$0xff] %v751_v5  ;;  %v752_v10 = vmax.f32 %v734_v6, 0.0 }
 0x210   : > { %765 = vst [vmem:[%s1319_s29 + $0x60] sm:$0xff] %v749_v8  ;;  %v750_v11 = vmax.f32 %v726_v9, 0.0 }
 0x211   : > { %768 = vst [vmem:[%s1319_s29 + $0x78] sm:$0xff] %v752_v10 }
 0x212   : > { %766 = vst [vmem:[%s1319_s29 + $0x68] sm:$0xff] %v750_v11 }
 0x213   : > { %1096 = shalt.err (!%p1093_p5)
}
 0x214   : > { %s1097_s13 = scalar_lea.hbm %s1339_s8, 2048  ;;  %s1101_s22 = scalar_lea.hbm %s1398_s4, 4096 }
 0x215   : > { %p1098_p6 = scmp.ne.s32.totalorder %s1339_s8, %s1097_s13  ;;  %p1102_p10 = scmp.lt.u32.totalorder %s1339_s8, %s1398_s4 }
 0x216   : > { %p1103_p11 = scmp.lt.u32.totalorder %s1101_s22, %s1097_s13  ;;  %p1105_p13 = scmp.lt.u32.totalorder %s1097_s13, %s1339_s8 }
 0x217   : > { %p1099_p7 = pnand %p1098_p6, %p1232_p4 }
 0x218   : > { %p1104_p12 = por %p1103_p11, %p1102_p10 }
 0x219   : > { %p1100_p9 = pneg %p1099_p7 }
 0x21a   : > { %p1106_p0 = por %p1105_p13, %p1104_p12 }
 0x21c   : > { %p1107_p1 = pnand %p1106_p0, %p1100_p9 }
 0x21e   : > { %1110 = shalt.err (!%p1107_p1)
}
 0x21f   : > { %s1165_s29 = smov 128   ;;  %s1166_s30 = smov 8  }
 0x220   : > { %1007 = dma.vmem_to_hbm [thread:$0]  (%p1232_p4), %s1341_s5, 2048, %s1339_s8, %s1348_s18, %s1165_s29, %s1165_s29, %s1166_s30  }
 0x221 PF: > { %p1013_p2 = scmp.ge.s32.totalorder %s1161_s20, 2  ;;  %s800_s6 = sand.u32 1, %s1141_s15  }
 0x222   : > { %s801_s7 = scalar_lea.sflag [#allocation4], %s800_s6 }
 0x223   : > { %p1010_p3 = pnand %p1013_p2, %p1239_p8 }
 0x225   : > { %1136 = dma.done.wait (!%p1010_p3), %s801_s7, 2048  }
 0x226   : > { %1138 = vsyncadd (!%p1010_p3), %s801_s7, 4294965248  ;;  %s17_s20 = sadd.s32 1, %s1161_s20   ;;  %s1401_s15 = smov %s1145_s16 }
 0x227   : > { %p14_p5 = scmp.ge.s32.totalorder %s17_s20, 4   ;;  %s1402_s16 = smov %s1149_s17 }
 0x228   : > { %s1403_s17 = smov %s1245_s28  ;;  %s1404_s18 = smov %s1157_s19 }
 0x229   : > { %s1405_s19 = smov %s1407_s23  ;;  %16 = sbr.rel (!%p14_p5) target bundleno = 4 (0x4), region = 83 }
 0x230   :  { %806 = vsyncpa [#allocation4], 1 }
 0x231   :  { %808 = vsyncpa [#allocation4 + $0x1], 1 }

</bundles_post_ra>
